<compile_context>
chip_gen: v7x
topology: tpu7x:2x2x1
jax: 0.10.0
libtpu: 0.0.40
codegen_flags: <defaults>
</compile_context>

<pallas_src>
import functools
import math

import jax
import jax.numpy as jnp
from jax.experimental import pallas as pl
from jax.experimental.pallas import tpu as pltpu


# ---------------------------------------------------------------------------
# Model config (DistilBERT-like, small deterministic stand-in backbone)
# ---------------------------------------------------------------------------
D_MODEL = 768
N_HEADS = 12
D_HEAD = D_MODEL // N_HEADS
D_FF = 3072
N_LAYERS = 2
VOCAB = 128
MAX_POS = 32
LN_EPS = 1e-12


def _pick_rows_tile(m):
    """Row tile: multiple of 8 giving >=2 grid steps when possible (v7x 2 TCs)."""
    if m % 8 == 0 and m >= 16:
        t = (m // 2 // 8) * 8
        while t >= 8:
            if m % t == 0:
                return t
            t -= 8
    return m


# ---------------------------------------------------------------------------
# In-kernel helpers (value level)
# ---------------------------------------------------------------------------
def _gelu(x):
    # TODO(synk): HF DistilBERT uses exact erf-GELU; tanh approximation is used
    # here (EUP tanh), differences are ~1e-3 relative.
    c = math.sqrt(2.0 / math.pi)
    return 0.5 * x * (1.0 + jnp.tanh(c * (x + 0.044715 * x * x * x)))


def _layernorm_val(x, g, b, eps):
    mu = jnp.mean(x, axis=-1, keepdims=True)
    var = jnp.mean((x - mu) * (x - mu), axis=-1, keepdims=True)
    return (x - mu) * jax.lax.rsqrt(var + eps) * g + b


# ---------------------------------------------------------------------------
# Pallas kernels
# ---------------------------------------------------------------------------
def _layernorm_kernel(x_ref, g_ref, b_ref, o_ref, *, eps):
    x = x_ref[...].astype(jnp.float32)
    o_ref[...] = _layernorm_val(x, g_ref[...], b_ref[...], eps).astype(o_ref.dtype)


def _encoder_layer_kernel(h_ref, bias_ref,
                          wqkv_ref, bqkv_ref, wo_ref, bo_ref,
                          ln1g_ref, ln1b_ref,
                          w1_ref, b1_ref, w2_ref, b2_ref,
                          ln2g_ref, ln2b_ref,
                          o_ref, *, n_heads, d_head, eps, packed):
    """One full encoder layer for one batch item (grid over batch).

    h_ref:    (1, S, D)  hidden states (f32)
    bias_ref: (1, H*S, H*S) additive attention bias: block-diagonal (same-head)
              + key-padding mask, precomputed in the wrapper.
    Weights are full bf16 arrays resident in VMEM for the whole call.
    """
    S = h_ref.shape[1]
    D = n_heads * d_head
    scale = 1.0 / math.sqrt(d_head)

    x = h_ref[0].astype(jnp.float32)                                   # (S, D)

    # ---- fused QKV projection (bf16 MXU, f32 accumulate) ----
    qkv = jnp.dot(x.astype(jnp.bfloat16), wqkv_ref[...],
                  preferred_element_type=jnp.float32) + bqkv_ref[...]  # (S, 3D)

    if packed:
        # Pack all heads onto the sublane axis: (S, H*Dh) -> (H*S, Dh), then do
        # ONE score matmul and ONE PV matmul with a block-diagonal mask bias.
        # Only "swap-last-two-dims" transposes and tile-regrouping reshapes are
        # used (the forms Mosaic supports).
        qkv_t = qkv.T                                                  # (3D, S)

        def pack(rows):                                                # (D,S)->(H*S,Dh)
            t3 = rows.reshape(n_heads, d_head, S)
            t3 = jnp.swapaxes(t3, 1, 2)                                # (H, S, Dh)
            return t3.reshape(n_heads * S, d_head)

        q_p = pack(qkv_t[0:D] * scale).astype(jnp.bfloat16)
        k_p = pack(qkv_t[D:2 * D]).astype(jnp.bfloat16)
        v_p = pack(qkv_t[2 * D:3 * D]).astype(jnp.bfloat16)

        s = jax.lax.dot_general(q_p, k_p, (((1,), (1,)), ((), ())),
                                preferred_element_type=jnp.float32)    # (HS, HS)
        s = s + bias_ref[0]
        s = s - jnp.max(s, axis=-1, keepdims=True)
        p = jnp.exp(s)
        p = p * pl.reciprocal(jnp.sum(p, axis=-1, keepdims=True), approx=True)
        ctx_p = jnp.dot(p.astype(jnp.bfloat16), v_p,
                        preferred_element_type=jnp.float32)            # (HS, Dh)

        c3 = ctx_p.reshape(n_heads, S, d_head)
        c3 = jnp.swapaxes(c3, 1, 2)                                    # (H, Dh, S)
        ctx = c3.reshape(D, S).T                                       # (S, D)
    else:
        # Fallback: per-head loop (always-lowers path, same math).
        key_bias = bias_ref[0][0:S, 0:S]          # key-padding bias of block 0
        outs = []
        for h in range(n_heads):
            qh = (qkv[:, h * d_head:(h + 1) * d_head] * scale).astype(jnp.bfloat16)
            kh = qkv[:, D + h * d_head:D + (h + 1) * d_head].astype(jnp.bfloat16)
            vh = qkv[:, 2 * D + h * d_head:2 * D + (h + 1) * d_head].astype(jnp.bfloat16)
            s = jax.lax.dot_general(qh, kh, (((1,), (1,)), ((), ())),
                                    preferred_element_type=jnp.float32) + key_bias
            s = s - jnp.max(s, axis=-1, keepdims=True)
            p = jnp.exp(s)
            p = p * pl.reciprocal(jnp.sum(p, axis=-1, keepdims=True), approx=True)
            outs.append(jnp.dot(p.astype(jnp.bfloat16), vh,
                                preferred_element_type=jnp.float32))
        ctx = jnp.concatenate(outs, axis=-1)                           # (S, D)

    # ---- output projection + residual + LayerNorm ----
    attn = jnp.dot(ctx.astype(jnp.bfloat16), wo_ref[...],
                   preferred_element_type=jnp.float32) + bo_ref[...]
    h1 = _layernorm_val(x + attn, ln1g_ref[...], ln1b_ref[...], eps)

    # ---- feed-forward + residual + LayerNorm ----
    ff = jnp.dot(h1.astype(jnp.bfloat16), w1_ref[...],
                 preferred_element_type=jnp.float32) + b1_ref[...]
    ff = _gelu(ff)
    ff2 = jnp.dot(ff.astype(jnp.bfloat16), w2_ref[...],
                  preferred_element_type=jnp.float32) + b2_ref[...]
    h2 = _layernorm_val(h1 + ff2, ln2g_ref[...], ln2b_ref[...], eps)

    o_ref[0] = h2.astype(o_ref.dtype)


def _head_kernel(x_ref, pw_ref, pb_ref, cw_ref, cb_ref, o_ref):
    """CLS-pooled features -> pre_classifier + ReLU -> classifier (padded N)."""
    x = x_ref[...].astype(jnp.bfloat16)                                # (B, D)
    pre = jnp.dot(x, pw_ref[...], preferred_element_type=jnp.float32) + pb_ref[...]
    pre = jnp.maximum(pre, 0.0)
    logits = jnp.dot(pre.astype(jnp.bfloat16), cw_ref[...],
                     preferred_element_type=jnp.float32) + cb_ref[...]
    o_ref[...] = logits.astype(o_ref.dtype)


# ---------------------------------------------------------------------------
# pallas_call wrappers
# ---------------------------------------------------------------------------
def _wspec(a):
    return pl.BlockSpec(a.shape, lambda b: (0, 0))


def layernorm(x, gamma, beta, eps=LN_EPS):
    """x: [M, D] layer-normalized over D (M-tiled parallel grid)."""
    M, D = x.shape
    tm = _pick_rows_tile(M)
    return pl.pallas_call(
        functools.partial(_layernorm_kernel, eps=eps),
        out_shape=jax.ShapeDtypeStruct((M, D), jnp.float32),
        grid_spec=pltpu.PrefetchScalarGridSpec(
            num_scalar_prefetch=0,
            grid=(M // tm,),
            in_specs=[
                pl.BlockSpec((tm, D), lambda i: (i, 0)),
                pl.BlockSpec((1, D), lambda i: (0, 0)),
                pl.BlockSpec((1, D), lambda i: (0, 0)),
            ],
            out_specs=pl.BlockSpec((tm, D), lambda i: (i, 0)),
        ),
        compiler_params=pltpu.CompilerParams(dimension_semantics=("parallel",)),
    )(x, gamma, beta)


def encoder_layer(h, bias, layer, packed, eps=LN_EPS):
    """h: [B, S, D] f32, bias: [B, H*S, H*S] f32 -> [B, S, D] f32."""
    B, S, D = h.shape
    HS = bias.shape[-1]
    kernel = functools.partial(_encoder_layer_kernel, n_heads=N_HEADS,
                               d_head=D_HEAD, eps=eps, packed=packed)
    return pl.pallas_call(
        kernel,
        out_shape=jax.ShapeDtypeStruct((B, S, D), jnp.float32),
        grid_spec=pltpu.PrefetchScalarGridSpec(
            num_scalar_prefetch=0,
            grid=(B,),
            in_specs=[
                pl.BlockSpec((1, S, D), lambda b: (b, 0, 0)),
                pl.BlockSpec((1, HS, HS), lambda b: (b, 0, 0)),
                _wspec(layer["wqkv"]), _wspec(layer["bqkv"]),
                _wspec(layer["wo"]), _wspec(layer["bo"]),
                _wspec(layer["ln1_g"]), _wspec(layer["ln1_b"]),
                _wspec(layer["w1"]), _wspec(layer["b1"]),
                _wspec(layer["w2"]), _wspec(layer["b2"]),
                _wspec(layer["ln2_g"]), _wspec(layer["ln2_b"]),
            ],
            out_specs=pl.BlockSpec((1, S, D), lambda b: (b, 0, 0)),
        ),
        compiler_params=pltpu.CompilerParams(
            dimension_semantics=("parallel",),
            # ~28 MB of double-buffered resident bf16 weights + temporaries.
            # 48 MiB fits v7x's 64 MiB physical VMEM and overrides v5e's 16 MiB
            # scoped default.
            vmem_limit_bytes=48 * 1024 * 1024),
    )(h, bias,
      layer["wqkv"], layer["bqkv"], layer["wo"], layer["bo"],
      layer["ln1_g"], layer["ln1_b"],
      layer["w1"], layer["b1"], layer["w2"], layer["b2"],
      layer["ln2_g"], layer["ln2_b"])


def classifier_head(pooled, pre_w, pre_b, cls_w, cls_b):
    """pooled: [B, D] -> logits [B, N_pad] (pre_classifier + ReLU + classifier)."""
    B, D = pooled.shape
    Np = cls_w.shape[1]
    # TODO(synk): grid=(1,) leaves one v7x TensorCore idle; negligible at B=2.
    return pl.pallas_call(
        _head_kernel,
        out_shape=jax.ShapeDtypeStruct((B, Np), jnp.float32),
        grid_spec=pltpu.PrefetchScalarGridSpec(
            num_scalar_prefetch=0,
            grid=(1,),
            in_specs=[
                pl.BlockSpec((B, D), lambda i: (0, 0)),
                _wspec(pre_w), _wspec(pre_b),
                _wspec(cls_w), _wspec(cls_b),
            ],
            out_specs=pl.BlockSpec((B, Np), lambda i: (0, 0)),
        ),
        compiler_params=pltpu.CompilerParams(dimension_semantics=("arbitrary",)),
    )(pooled, pre_w, pre_b, cls_w, cls_b)


# ---------------------------------------------------------------------------
# Parameters + forward (glue in plain JAX, compute in kernels)
# ---------------------------------------------------------------------------
def init_params(key, num_out=1000):
    def nrm(k, shape, s=0.02):
        return (s * jax.random.normal(k, shape)).astype(jnp.float32)

    num_out_pad = ((num_out + 127) // 128) * 128   # lane-dense classifier output

    keys = iter(jax.random.split(key, 4 + 4 * N_LAYERS))
    params = {
        "num_out": num_out,
        "word_emb": nrm(next(keys), (VOCAB, D_MODEL)),
        "pos_emb": nrm(next(keys), (MAX_POS, D_MODEL)),
        "emb_ln_g": jnp.ones((1, D_MODEL), jnp.float32),
        "emb_ln_b": jnp.zeros((1, D_MODEL), jnp.float32),
        "pre_w": nrm(next(keys), (D_MODEL, D_MODEL)).astype(jnp.bfloat16),
        "pre_b": jnp.zeros((1, D_MODEL), jnp.float32),
        # Replaced classifier head, padded to a multiple of 128 output columns.
        "cls_w": jnp.pad(nrm(next(keys), (D_MODEL, num_out)),
                         ((0, 0), (0, num_out_pad - num_out))
                         ).astype(jnp.bfloat16),
        "cls_b": jnp.zeros((1, num_out_pad), jnp.float32),
        "layers": [],
    }
    for _ in range(N_LAYERS):
        layer = {
            # Fused Q|K|V projection ([Q|K|V] column blocks, 64-wide per head).
            "wqkv": nrm(next(keys), (D_MODEL, 3 * D_MODEL)).astype(jnp.bfloat16),
            "bqkv": jnp.zeros((1, 3 * D_MODEL), jnp.float32),
            "wo": nrm(next(keys), (D_MODEL, D_MODEL)).astype(jnp.bfloat16),
            "bo": jnp.zeros((1, D_MODEL), jnp.float32),
            "ln1_g": jnp.ones((1, D_MODEL), jnp.float32),
            "ln1_b": jnp.zeros((1, D_MODEL), jnp.float32),
            "w1": nrm(next(keys), (D_MODEL, D_FF)).astype(jnp.bfloat16),
            "b1": jnp.zeros((1, D_FF), jnp.float32),
            "w2": nrm(next(keys), (D_FF, D_MODEL)).astype(jnp.bfloat16),
            "b2": jnp.zeros((1, D_MODEL), jnp.float32),
            "ln2_g": jnp.ones((1, D_MODEL), jnp.float32),
            "ln2_b": jnp.zeros((1, D_MODEL), jnp.float32),
        }
        params["layers"].append(layer)
    return params


def text_model_forward(params, input_ids, attention_mask, packed_attention=True):
    """input_ids, attention_mask: [B, S] int32 -> logits [B, num_out] f32."""
    B, S = input_ids.shape
    assert S <= MAX_POS, "sequence longer than position-embedding table"

    # Embeddings (gather is glue) + LayerNorm kernel.
    h = params["word_emb"][input_ids] + params["pos_emb"][:S][None, :, :]
    h = layernorm(h.reshape(B * S, D_MODEL),
                  params["emb_ln_g"], params["emb_ln_b"])
    h = h.reshape(B, S, D_MODEL)

    # Combined additive attention bias for the packed (H*S, H*S) score matrix:
    # allow only same-head blocks and valid (non-padded) keys.  Glue-level.
    hs = N_HEADS * S
    blk = jnp.arange(hs) // S
    same_head = blk[:, None] == blk[None, :]                       # (HS, HS)
    key_ok = jnp.tile(attention_mask > 0, (1, N_HEADS))            # (B, HS)
    allow = same_head[None, :, :] & key_ok[:, None, :]
    bias = jnp.where(allow, 0.0, -1e9).astype(jnp.float32)         # (B, HS, HS)

    for layer in params["layers"]:
        h = encoder_layer(h, bias, layer, packed=packed_attention)

    # CLS pooling (slice is glue) -> fused pre_classifier + ReLU + classifier.
    # Dropout omitted (eval-mode identity).
    pooled = h[:, 0, :]                                            # [B, D]
    logits = classifier_head(pooled, params["pre_w"], params["pre_b"],
                             params["cls_w"], params["cls_b"])
    return logits[:, :params["num_out"]]


if __name__ == "__main__":
    NUM_OUT = 1000
    B, S = 2, 8

    key = jax.random.PRNGKey(0)
    k_params, k_ids = jax.random.split(key, 2)

    params = init_params(k_params, num_out=NUM_OUT)
    input_ids = jax.random.randint(k_ids, (B, S), 0, VOCAB, dtype=jnp.int32)
    # Simple padding mask: first row fully valid, second row has 2 pad tokens.
    attention_mask = jnp.array(
        [[1] * S, [1] * (S - 2) + [0] * 2], dtype=jnp.int32)

    try:
        logits = jax.block_until_ready(
            text_model_forward(params, input_ids, attention_mask,
                               packed_attention=True))
    except Exception:
        # TODO(synk): the packed-head path relies on in-kernel minor-dim
        # transposes; if the Mosaic toolchain rejects them, fall back to the
        # mathematically identical per-head-loop variant.
        logits = jax.block_until_ready(
            text_model_forward(params, input_ids, attention_mask,
                               packed_attention=False))

    assert logits.shape == (B, NUM_OUT) and logits.dtype == jnp.float32
    assert bool(jnp.all(jnp.isfinite(logits)))
    print("KERNEL_OK")
</pallas_src>

<mosaic_0001>
module attributes {stable_mosaic.version = 11 : i64} {
  func.func @_layernorm_kernel(%arg0: i32, %arg1: memref<8x768xf32, #tpu.memory_space<vmem>>, %arg2: memref<1x768xf32, #tpu.memory_space<vmem>>, %arg3: memref<1x768xf32, #tpu.memory_space<vmem>>, %arg4: memref<8x768xf32, #tpu.memory_space<vmem>>) attributes {dimension_semantics = [#tpu.dimension_semantics<parallel>], iteration_bounds = array<i64: 2>, scalar_prefetch = 0 : i64, scratch_operands = 0 : i64, tpu.core_type = #tpu.core_type<tc>, window_params = [{transform_indices = @transform_0, window_bounds = array<i64: 8, 768>}, {pipeline_mode = #tpu.pipeline_mode<synchronous>, transform_indices = @transform_1, window_bounds = array<i64: 1, 768>}, {pipeline_mode = #tpu.pipeline_mode<synchronous>, transform_indices = @transform_2, window_bounds = array<i64: 1, 768>}, {transform_indices = @transform_3, window_bounds = array<i64: 8, 768>}]} {
    %c0 = arith.constant 0 : index
    %c0_0 = arith.constant 0 : index
    %0 = vector.load %arg1[%c0, %c0_0] : memref<8x768xf32, #tpu.memory_space<vmem>>, vector<8x768xf32>
    %c0_1 = arith.constant 0 : index
    %c0_2 = arith.constant 0 : index
    %1 = vector.load %arg2[%c0_1, %c0_2] : memref<1x768xf32, #tpu.memory_space<vmem>>, vector<1x768xf32>
    %c0_3 = arith.constant 0 : index
    %c0_4 = arith.constant 0 : index
    %2 = vector.load %arg3[%c0_3, %c0_4] : memref<1x768xf32, #tpu.memory_space<vmem>>, vector<1x768xf32>
    %cst = arith.constant dense<0.000000e+00> : vector<8xf32>
    %3 = vector.multi_reduction <add>, %0, %cst [1] : vector<8x768xf32> to vector<8xf32>
    %4 = vector.shape_cast %3 : vector<8xf32> to vector<8x1xf32>
    %cst_5 = arith.constant 7.680000e+02 : f32
    %5 = vector.broadcast %cst_5 : f32 to vector<8x1xf32>
    %6 = arith.divf %4, %5 : vector<8x1xf32>
    %7 = vector.broadcast %6 : vector<8x1xf32> to vector<8x768xf32>
    %8 = arith.subf %0, %7 : vector<8x768xf32>
    %9 = vector.broadcast %6 : vector<8x1xf32> to vector<8x768xf32>
    %10 = arith.subf %0, %9 : vector<8x768xf32>
    %11 = arith.mulf %8, %10 : vector<8x768xf32>
    %cst_6 = arith.constant dense<0.000000e+00> : vector<8xf32>
    %12 = vector.multi_reduction <add>, %11, %cst_6 [1] : vector<8x768xf32> to vector<8xf32>
    %13 = vector.shape_cast %12 : vector<8xf32> to vector<8x1xf32>
    %cst_7 = arith.constant 7.680000e+02 : f32
    %14 = vector.broadcast %cst_7 : f32 to vector<8x1xf32>
    %15 = arith.divf %13, %14 : vector<8x1xf32>
    %16 = vector.broadcast %6 : vector<8x1xf32> to vector<8x768xf32>
    %17 = arith.subf %0, %16 : vector<8x768xf32>
    %cst_8 = arith.constant 9.99999996E-13 : f32
    %18 = vector.broadcast %cst_8 : f32 to vector<8x1xf32>
    %19 = arith.addf %15, %18 : vector<8x1xf32>
    %20 = math.rsqrt %19 : vector<8x1xf32>
    %21 = vector.broadcast %20 : vector<8x1xf32> to vector<8x768xf32>
    %22 = arith.mulf %17, %21 : vector<8x768xf32>
    %23 = vector.broadcast %1 : vector<1x768xf32> to vector<8x768xf32>
    %24 = arith.mulf %22, %23 : vector<8x768xf32>
    %25 = vector.broadcast %2 : vector<1x768xf32> to vector<8x768xf32>
    %26 = arith.addf %24, %25 : vector<8x768xf32>
    %c0_9 = arith.constant 0 : index
    %c0_10 = arith.constant 0 : index
    %27 = vector.load %arg4[%c0_9, %c0_10] : memref<8x768xf32, #tpu.memory_space<vmem>>, vector<8x768xf32>
    tpu.vector_store %arg4[%c0_9, %c0_10], %26 {strides = array<i32>} : memref<8x768xf32, #tpu.memory_space<vmem>>, vector<8x768xf32>,
    return
  }
  func.func @transform_0(%arg0: i32) -> (i32, i32) {
    %c0_i32 = arith.constant 0 : i32
    %c0_i32_0 = arith.constant 0 : i32
    return %arg0, %c0_i32 : i32, i32
  }
  func.func @transform_1(%arg0: i32) -> (i32, i32) {
    %c0_i32 = arith.constant 0 : i32
    %c0_i32_0 = arith.constant 0 : i32
    %c0_i32_1 = arith.constant 0 : i32
    return %c0_i32, %c0_i32_0 : i32, i32
  }
  func.func @transform_2(%arg0: i32) -> (i32, i32) {
    %c0_i32 = arith.constant 0 : i32
    %c0_i32_0 = arith.constant 0 : i32
    %c0_i32_1 = arith.constant 0 : i32
    return %c0_i32, %c0_i32_0 : i32, i32
  }
  func.func @transform_3(%arg0: i32) -> (i32, i32) {
    %c0_i32 = arith.constant 0 : i32
    %c0_i32_0 = arith.constant 0 : i32
    return %arg0, %c0_i32 : i32, i32
  }
}

module attributes {stable_mosaic.version = 11 : i64} {
  func.func @_layernorm_kernel(%arg0: i32, %arg1: memref<8x768xf32, #tpu.memory_space<vmem>>, %arg2: memref<1x768xf32, #tpu.memory_space<vmem>>, %arg3: memref<1x768xf32, #tpu.memory_space<vmem>>, %arg4: memref<8x768xf32, #tpu.memory_space<vmem>>) attributes {dimension_semantics = [#tpu.dimension_semantics<parallel>], iteration_bounds = array<i64: 2>, scalar_prefetch = 0 : i64, scratch_operands = 0 : i64, tpu.core_type = #tpu.core_type<tc>, window_params = [{transform_indices = @transform_0, window_bounds = array<i64: 8, 768>}, {pipeline_mode = #tpu.pipeline_mode<synchronous>, transform_indices = @transform_1, window_bounds = array<i64: 1, 768>}, {pipeline_mode = #tpu.pipeline_mode<synchronous>, transform_indices = @transform_2, window_bounds = array<i64: 1, 768>}, {transform_indices = @transform_3, window_bounds = array<i64: 8, 768>}]} {
    %c0 = arith.constant 0 : index
    %c0_0 = arith.constant 0 : index
    %0 = vector.load %arg1[%c0, %c0_0] : memref<8x768xf32, #tpu.memory_space<vmem>>, vector<8x768xf32>
    %c0_1 = arith.constant 0 : index
    %c0_2 = arith.constant 0 : index
    %1 = vector.load %arg2[%c0_1, %c0_2] : memref<1x768xf32, #tpu.memory_space<vmem>>, vector<1x768xf32>
    %c0_3 = arith.constant 0 : index
    %c0_4 = arith.constant 0 : index
    %2 = vector.load %arg3[%c0_3, %c0_4] : memref<1x768xf32, #tpu.memory_space<vmem>>, vector<1x768xf32>
    %cst = arith.constant dense<0.000000e+00> : vector<8xf32>
    %3 = vector.multi_reduction <add>, %0, %cst [1] : vector<8x768xf32> to vector<8xf32>
    %4 = vector.shape_cast %3 : vector<8xf32> to vector<8x1xf32>
    %cst_5 = arith.constant 7.680000e+02 : f32
    %5 = vector.broadcast %cst_5 : f32 to vector<8x1xf32>
    %6 = arith.divf %4, %5 : vector<8x1xf32>
    %7 = vector.broadcast %6 : vector<8x1xf32> to vector<8x768xf32>
    %8 = arith.subf %0, %7 : vector<8x768xf32>
    %9 = vector.broadcast %6 : vector<8x1xf32> to vector<8x768xf32>
    %10 = arith.subf %0, %9 : vector<8x768xf32>
    %11 = arith.mulf %8, %10 : vector<8x768xf32>
    %cst_6 = arith.constant dense<0.000000e+00> : vector<8xf32>
    %12 = vector.multi_reduction <add>, %11, %cst_6 [1] : vector<8x768xf32> to vector<8xf32>
    %13 = vector.shape_cast %12 : vector<8xf32> to vector<8x1xf32>
    %cst_7 = arith.constant 7.680000e+02 : f32
    %14 = vector.broadcast %cst_7 : f32 to vector<8x1xf32>
    %15 = arith.divf %13, %14 : vector<8x1xf32>
    %16 = vector.broadcast %6 : vector<8x1xf32> to vector<8x768xf32>
    %17 = arith.subf %0, %16 : vector<8x768xf32>
    %cst_8 = arith.constant 9.99999996E-13 : f32
    %18 = vector.broadcast %cst_8 : f32 to vector<8x1xf32>
    %19 = arith.addf %15, %18 : vector<8x1xf32>
    %20 = math.rsqrt %19 : vector<8x1xf32>
    %21 = vector.broadcast %20 : vector<8x1xf32> to vector<8x768xf32>
    %22 = arith.mulf %17, %21 : vector<8x768xf32>
    %23 = vector.broadcast %1 : vector<1x768xf32> to vector<8x768xf32>
    %24 = arith.mulf %22, %23 : vector<8x768xf32>
    %25 = vector.broadcast %2 : vector<1x768xf32> to vector<8x768xf32>
    %26 = arith.addf %24, %25 : vector<8x768xf32>
    %c0_9 = arith.constant 0 : index
    %c0_10 = arith.constant 0 : index
    %27 = vector.load %arg4[%c0_9, %c0_10] : memref<8x768xf32, #tpu.memory_space<vmem>>, vector<8x768xf32>
    tpu.vector_store %arg4[%c0_9, %c0_10], %26 {strides = array<i32>} : memref<8x768xf32, #tpu.memory_space<vmem>>, vector<8x768xf32>,
    return
  }
  func.func @transform_0(%arg0: i32) -> (i32, i32) {
    %c0_i32 = arith.constant 0 : i32
    %c0_i32_0 = arith.constant 0 : i32
    return %arg0, %c0_i32 : i32, i32
  }
  func.func @transform_1(%arg0: i32) -> (i32, i32) {
    %c0_i32 = arith.constant 0 : i32
    %c0_i32_0 = arith.constant 0 : i32
    %c0_i32_1 = arith.constant 0 : i32
    return %c0_i32, %c0_i32_0 : i32, i32
  }
  func.func @transform_2(%arg0: i32) -> (i32, i32) {
    %c0_i32 = arith.constant 0 : i32
    %c0_i32_0 = arith.constant 0 : i32
    %c0_i32_1 = arith.constant 0 : i32
    return %c0_i32, %c0_i32_0 : i32, i32
  }
  func.func @transform_3(%arg0: i32) -> (i32, i32) {
    %c0_i32 = arith.constant 0 : i32
    %c0_i32_0 = arith.constant 0 : i32
    return %arg0, %c0_i32 : i32, i32
  }
}

</mosaic_0001>

<bundles_post_ra>
// kernel: tpu_custom_call.1
= control target key start
LH: loop header
LB: loop body
LE: loop exit
PB: predicated region body
PF: predicated region fallthrough
CT: control target
= control target key end

     0   :  { %8 = vsyncpa [#allocation3], 0  ;;  %s854_s0 = inlined_call_operand.hbm [shape: f32[16,768], index: 0, kind: input, shape index: {}]   ;;  %s855_s1 = inlined_call_operand.hbm [shape: f32[1,768], index: 1, kind: input, shape index: {}]   ;;  %s856_s2 = inlined_call_operand.vmem [shape: f32[1,768], index: 2, kind: input, shape index: {}]   ;;  %s857_s3 = inlined_call_operand.hbm [shape: f32[16,768], index: 3, kind: output, shape index: {}]  }
   0x1   :  { %10 = vsyncpa [#allocation3 + $0x1], 0 }
   0x2   :  { %11 = vsyncpa [#allocation6], 0 }
   0x3   :  { %12 = vsyncpa [#allocation4], 0 }
   0x4   :  { %14 = vsyncpa [#allocation4 + $0x1], 0  ;;  %s646_s12 = smov 0   ;;  %s648_s13 = smov 0  }
   0x5   :  { %s650_s14 = smov 0   ;;  %s652_s15 = smov 0  }
   0x6 LB: > { %s667_s16 = sadd.s32 4294967295, %s621_s15   ;;  %s420_s17 = sadd.s32 4294967294, %s621_s15   ;;  %s621_s15 = sphi %s652_s15, %s881_s15   ;;  %s617_s14 = sphi %s650_s14, %s880_s14   ;;  %s613_s13 = sphi %s648_s13, %s879_s13   ;;  %s609_s12 = sphi %s646_s12, %s878_s12  }
   0x7   : > { %p40_p0 = scmp.ne.s32.totalorder %s613_s13, %s609_s12  ;;  %p858_p1 = scmp.eq.s32.totalorder %s667_s16, 0 }
   0x8   : > { %p112_p3 = scmp.eq.s32.totalorder %s420_s17, 1  ;;  %p421_p5 = scmp.ge.s32.totalorder %s621_s15, 1 }
   0x9   : > { %p676_p4 = por %p858_p1, %p40_p0  ;;  %p119_p7 = scmp.lt.s32.totalorder %s621_s15, 3 }
   0xa   : > { %p681_p6 = por %p112_p3, %p40_p0  ;;  %s623_s21 = smov [#allocation5]  }
   0xb   : > { %s861_s18 = scalar_select %p676_p4, 1, 0 }
   0xc   : > { %s862_s19 = scalar_select %p681_p6, 1, 0 }
   0xd   : > { %p686_p8 = pnand %p421_p5, %p119_p7  ;;  %s132_s22 = sshll.u32 %s623_s21, 4  ;;  %s133_s22 = int_to_ptr.vmem [resolvable:$true] %s132_s22 }
   0xe   : > { %s694_s23 = sadd.s32 1, %s621_s15   ;;  %s27_s27 = sadd.s32 1, %s617_s14 }
   0xf   : > { %s863_s20 = scalar_select %p686_p8, 1, 0 }
  0x10   : > { %p442_p10 = pneg %p686_p8  ;;  %s24_s25 = ssub.s32 %s621_s15, %s694_s23 }
  0x11   : > { %p704_p12 = scmp.eq.s32.totalorder %s24_s25, 0  ;;  %s493_s30 = scalar_lea.hbm %s855_s1, 96 }
  0x12   : > { %p698_p11 = pnand %p442_p10, %p858_p1  ;;  %p494_p0 = scmp.ne.s32.totalorder %s855_s1, %s493_s30 }
  0x13   : > { %s865_s26 = scalar_select %p704_p12, 1, 0 }
  0x14   : > { %p495_p3 = pneg %p698_p11  ;;  %p500_p10 = scmp.lt.u32.totalorder %s493_s30, %s855_s1 }
  0x16   : > { %p496_p5 = pnand %p495_p3, %p494_p0 }
  0x18   : > { %p497_p7 = pneg %p496_p5 }
  0x1a   : > { %p502_p9 = pnand %p500_p10, %p497_p7 }
  0x1c   : > { %505 = shalt.err (!%p502_p9)
}
  0x1d   : > { %s506_s8 = scalar_lea.vmem %s133_s22, 96  ;;  %p514_p6 = scmp.lt.s32.totalorder %s133_s22, %s133_s22 }
  0x1e   : > { %p507_p1 = scmp.ne.s32.totalorder %s133_s22, %s506_s8  ;;  %p515_p4 = scmp.lt.s32.totalorder %s506_s8, %s506_s8 }
  0x20   : > { %p509_p2 = pnand %p507_p1, %p495_p3  ;;  %p516_p8 = por %p515_p4, %p514_p6 }
  0x22   : > { %p510_p13 = pneg %p509_p2 }
  0x24   : > { %p517_p12 = pnand %p516_p8, %p510_p13 }
  0x26   : > { %520 = shalt.err (!%p517_p12)
}
  0x27   : > { %445 = dma.hbm_to_vmem [thread:$0]  (!%p698_p11), %s855_s1, 96, %s133_s22, [#allocation6]  }
  0x28   : > { %p866_p1 = scmp.ne.s32.totalorder %s865_s26, 0  ;;  %p35_p2 = scmp.eq.s32.totalorder %s621_s15, 0 }
  0x29   : > { %p867_p4 = scmp.ne.s32.totalorder %s617_s14, %s613_s13  ;;  %p868_p6 = scmp.eq.s32.totalorder %s667_s16, 1 }
  0x2a   : > { %s730_s11 = scalar_select %p866_p1, %s617_s14, %s27_s27  }
  0x2b   : > { %p738_p8 = por %p868_p6, %p867_p4  ;;  %p455_p9 = scmp.lt.s32.totalorder %s621_s15, 2 }
  0x2c   : > { %s146_s21 = sand.u32 1, %s617_s14   ;;  %p870_p12 = pmov %p867_p4 }
  0x2d   : > { %s430_s24 = smul.u32 48, %s146_s21  ;;  %s147_s4 = scalar_lea.sflag [#allocation3], %s146_s21 }
  0x2e   : > { %p36_p13 = por %p35_p2, %p870_p12  ;;  %s431_s25 = smul.u32 768, %s621_s15 }
  0x2f   : > { %s150_s29 = scalar_lea.vmem [#allocation2], %s430_s24  ;;  %s526_s8 = scalar_lea.hbm %s854_s0, 1536 }
  0x30   : > { %p748_p0 = pnand %p455_p9, %p36_p13  ;;  %s755_s27 = scalar_lea.hbm %s854_s0, %s431_s25 }
  0x31   : > { %s158_s30 = sshll.u32 %s150_s29, 4  ;;  %s521_s5 = scalar_lea.hbm %s755_s27, 768  ;;  %s757_s30 = int_to_ptr.vmem [resolvable:$true] %s158_s30 }
  0x32   : > { %p522_p11 = scmp.ne.s32.totalorder %s755_s27, %s521_s5  ;;  %p523_p3 = pneg %p748_p0 }
  0x33   : > { %p527_p10 = scmp.lt.u32.totalorder %s755_s27, %s854_s0  ;;  %p528_p1 = scmp.lt.u32.totalorder %s526_s8, %s521_s5 }
  0x34   : > { %p524_p5 = pnand %p523_p3, %p522_p11  ;;  %p530_p4 = scmp.lt.u32.totalorder %s521_s5, %s755_s27 }
  0x35   : > { %p529_p2 = por %p528_p1, %p527_p10 }
  0x36   : > { %p525_p7 = pneg %p524_p5 }
  0x37   : > { %p531_p6 = por %p530_p4, %p529_p2 }
  0x39   : > { %p532_p9 = pnand %p531_p6, %p525_p7 }
  0x3b   : > { %535 = shalt.err (!%p532_p9)
}
  0x3c   : > { %s536_s21 = scalar_lea.vmem %s757_s30, 768  ;;  %s624_s24 = smov [#allocation2]  }
  0x3d   : > { %p537_p12 = scmp.ne.s32.totalorder %s757_s30, %s536_s21  ;;  %s541_s25 = sshll.u32 %s624_s24, 4  ;;  %s542_s25 = int_to_ptr.vmem [resolvable:$false] %s541_s25 }
  0x3e   : > { %s543_s22 = scalar_lea.vmem %s542_s25, 1536  ;;  %p544_p5 = scmp.lt.s32.totalorder %s757_s30, %s542_s25 }
  0x3f   : > { %p539_p13 = pnand %p537_p12, %p523_p3  ;;  %p545_p10 = scmp.lt.s32.totalorder %s543_s22, %s536_s21 }
  0x41   : > { %p540_p11 = pneg %p539_p13  ;;  %p546_p1 = por %p545_p10, %p544_p5 }
  0x43   : > { %p547_p2 = pnand %p546_p1, %p540_p11 }
  0x45   : > { %550 = shalt.err (!%p547_p2)
}
  0x46   : > { %449 = dma.hbm_to_vmem [thread:$0]  (!%p748_p0), %s755_s27, 768, %s757_s30, %s147_s4  }
  0x47   : > { %p872_p7 = scmp.ne.s32.totalorder %s863_s20, 0 }
  0x48   : > { %s787_s26 = sand.u32 (!%p872_p7), 1, %s613_s13   ;;  %p873_p3 = scmp.ne.s32.totalorder (!%p872_p7), %s861_s18, 0 }
  0x49   : > { %167 = sbr.rel (%p872_p7) target bundleno = 432 (0x1b0), region = 32  ;;  %s170_s5 = scalar_lea.sflag (!%p872_p7), [#allocation3], %s787_s26 }
  0x4a   : > { %s432_s29 = smul.u32 (!%p872_p7), 48, %s787_s26 }
  0x4c   : > { %s173_s6 = scalar_lea.vmem (!%p872_p7), [#allocation2], %s432_s29 }
  0x50   : > { %596 = dma.done.wait (%p873_p3), %s170_s5, 768  }
  0x51   : > { %598 = vsyncadd (%p873_p3), %s170_s5, 4294966528  ;;  %p874_p0 = scmp.eq.s32.totalorder %s667_s16, 0 }
  0x53   : > { %600 = dma.done.wait (%p874_p0), [#allocation6], 96   ;;  %p875_p4 = pmov %p874_p0 }
  0x54   : > { %v200_v0 = vld [vmem:[%s173_s6] sm:$0xff]  ;;  %v201_v1 = vld [vmem:[%s173_s6 + $0x8] sm:$0xff]  ;;  %v202_v2 = vld [vmem:[%s173_s6 + $0x10] sm:$0xff]  ;;  %v246_v32 = vlaneseq  ;;  %s433_s28 = smul.u32 768, %s667_s16  ;;  %s199_s27 = scalar_lea.vmem [#allocation7], %s432_s29 }
  0x55   : > { %602 = vsyncadd (%p875_p4), [#allocation6], 4294967200  ;;  %v208_v3 = vadd.f32 %v201_v1, %v200_v0  ;;  %v203_v4 = vld [vmem:[%s173_s6 + $0x18] sm:$0xff]  ;;  %v204_v6 = vld [vmem:[%s173_s6 + $0x20] sm:$0xff]  ;;  %s340_s30 = sshll.u32 %s199_s27, 4  ;;  %s326_s8 = scalar_lea.sflag [#allocation4], %s787_s26  ;;  %s812_s30 = int_to_ptr.vmem [resolvable:$true] %s340_s30 }
  0x56   : > { %v205_v8 = vld [vmem:[%s173_s6 + $0x28] sm:$0xff]  ;;  %v247_v34 = vshrl.u32 %v246_v32, 7  ;;  %v206_v37 = vld [vmem:[#allocation5] sm:$0x3f]  ;;  %s810_s16 = scalar_lea.hbm %s857_s3, %s433_s28  ;;  %s551_s9 = scalar_lea.vmem %s812_s30, 768 }
  0x57   : > { %v209_v5 = vadd.f32 %v208_v3, %v202_v2  ;;  %v207_v42 = vld [vmem:[%s856_s2] sm:$0x3f]  ;;  %p552_p6 = scmp.ne.s32.totalorder %s812_s30, %s551_s9  ;;  %s625_s10 = smov [#allocation7]  }
  0x58   : > { %v248_v35 = vsub.s32 0, %v247_v34  ;;  %v252_v36 = vsub.s32 1, %v247_v34  ;;  %v256_v38 = vsub.s32 2, %v247_v34  ;;  %v260_v39 = vsub.s32 3, %v247_v34  ;;  %s555_s21 = sshll.u32 %s625_s10, 4  ;;  %s556_s21 = int_to_ptr.vmem [resolvable:$false] %s555_s21 }
  0x59   : > { %v210_v7 = vadd.f32 %v209_v5, %v203_v4  ;;  %v264_v40 = vsub.s32 4, %v247_v34  ;;  %v268_v41 = vsub.s32 5, %v247_v34  ;;  %p553_p9 = pnand %p552_p6, %p738_p8  ;;  %s557_s24 = scalar_lea.vmem %s556_s21, 1536 }
  0x5a   : > { %v249_v43 = vrot.slane %v206_v37, %v248_v35  ;;  %v253_v44 = vrot.slane %v206_v37, %v252_v36  ;;  %v257_v45 = vrot.slane %v206_v37, %v256_v38  ;;  %v261_v46 = vrot.slane %v206_v37, %v260_v39  ;;  %p558_p13 = scmp.lt.s32.totalorder %s812_s30, %s556_s21  ;;  %p559_p11 = scmp.lt.s32.totalorder %s557_s24, %s551_s9 }
  0x5b   : > { %v211_v9 = vadd.f32 %v210_v7, %v204_v6  ;;  %v265_v47 = vrot.slane %v206_v37, %v264_v40  ;;  %v269_v48 = vrot.slane %v206_v37, %v268_v41  ;;  %v286_v50 = vrot.slane %v207_v42, %v248_v35  ;;  %p554_p12 = pneg %p553_p9 }
  0x5c   : > { %v290_v51 = vrot.slane %v207_v42, %v252_v36  ;;  %v294_v52 = vrot.slane %v207_v42, %v256_v38  ;;  %v298_v53 = vrot.slane %v207_v42, %v260_v39  ;;  %v302_v60 = vrot.slane %v207_v42, %v264_v40  ;;  %p560_p5 = por %p559_p11, %p558_p13 }
  0x5d   : > { %v212_v10 = vadd.f32 %v211_v9, %v205_v8  ;;  %v306_v61 = vrot.slane %v207_v42, %v268_v41 }
  0x5e   : > { %p561_p10 = pnand %p560_p5, %p554_p12 }
  0x5f   : > { %213 = vadd.xlane.f32.xlu0 %v212_v10 }
  0xec   : > { %v214_v11 = vpop.xlane.xlu0 %213 }
  0xed   : > { %v216_v12 = vmul.f32 0.0013020834, %v214_v11 }
  0xef   : > { %v217_v13 = vsub.f32 %v200_v0, %v216_v12  ;;  %v218_v14 = vsub.f32 %v201_v1, %v216_v12  ;;  %v219_v15 = vsub.f32 %v202_v2, %v216_v12  ;;  %v220_v16 = vsub.f32 %v203_v4, %v216_v12 }
  0xf0   : > { %v221_v19 = vsub.f32 %v204_v6, %v216_v12  ;;  %v222_v22 = vsub.f32 %v205_v8, %v216_v12 }
  0xf1   : > { %v223_v17 = vmul.f32 %v217_v13, %v217_v13  ;;  %v224_v18 = vmul.f32 %v218_v14, %v218_v14  ;;  %v225_v20 = vmul.f32 %v219_v15, %v219_v15  ;;  %v226_v23 = vmul.f32 %v220_v16, %v220_v16 }
  0xf2   : > { %v227_v25 = vmul.f32 %v221_v19, %v221_v19  ;;  %v228_v27 = vmul.f32 %v222_v22, %v222_v22 }
  0xf3   : > { %v229_v21 = vadd.f32 %v224_v18, %v223_v17 }
  0xf5   : > { %v230_v24 = vadd.f32 %v229_v21, %v225_v20 }
  0xf7   : > { %v231_v26 = vadd.f32 %v230_v24, %v226_v23 }
  0xf9   : > { %v232_v28 = vadd.f32 %v231_v26, %v227_v25 }
  0xfb   : > { %v233_v29 = vadd.f32 %v232_v28, %v228_v27 }
  0xfd   : > { %234 = vadd.xlane.f32.xlu0 %v233_v29 }
 0x18a   : > { %v235_v30 = vpop.xlane.xlu0 %234 }
 0x18b   : > { %v236_v31 = vmul.f32 0.0013020834, %v235_v30 }
 0x18d   : > { %v237_v33 = vadd.f32 1e-12, %v236_v31 }
 0x18f   : > { %491 = vrsqrt.f32 %v237_v33 }
 0x199   : > { %v492_v49 = vpop.eup %491 }
 0x19a   : > { %v239_v54 = vmul.f32 %v492_v49, %v217_v13  ;;  %v240_v55 = vmul.f32 %v492_v49, %v218_v14  ;;  %v241_v56 = vmul.f32 %v492_v49, %v219_v15  ;;  %v242_v57 = vmul.f32 %v492_v49, %v220_v16 }
 0x19b   : > { %v243_v58 = vmul.f32 %v492_v49, %v221_v19  ;;  %v244_v59 = vmul.f32 %v492_v49, %v222_v22 }
 0x19c   : > { %v276_v62 = vmul.f32 %v249_v43, %v239_v54  ;;  %v277_v63 = vmul.f32 %v253_v44, %v240_v55  ;;  %v278_v0 = vmul.f32 %v257_v45, %v241_v56  ;;  %v279_v1 = vmul.f32 %v261_v46, %v242_v57 }
 0x19d   : > { %v280_v2 = vmul.f32 %v265_v47, %v243_v58  ;;  %v281_v3 = vmul.f32 %v269_v48, %v244_v59 }
 0x19e   : > { %v313_v4 = vadd.f32 %v286_v50, %v276_v62  ;;  %v314_v5 = vadd.f32 %v290_v51, %v277_v63  ;;  %v315_v6 = vadd.f32 %v294_v52, %v278_v0  ;;  %v316_v7 = vadd.f32 %v298_v53, %v279_v1 }
 0x19f   : > { %v317_v8 = vadd.f32 %v302_v60, %v280_v2  ;;  %v318_v9 = vadd.f32 %v306_v61, %v281_v3 }
 0x1a0   : > { %319 = vst [vmem:[%s199_s27] sm:$0xff] %v313_v4  ;;  %320 = vst [vmem:[%s199_s27 + $0x8] sm:$0xff] %v314_v5 }
 0x1a1   : > { %321 = vst [vmem:[%s199_s27 + $0x10] sm:$0xff] %v315_v6  ;;  %322 = vst [vmem:[%s199_s27 + $0x18] sm:$0xff] %v316_v7 }
 0x1a2   : > { %323 = vst [vmem:[%s199_s27 + $0x20] sm:$0xff] %v317_v8  ;;  %324 = vst [vmem:[%s199_s27 + $0x28] sm:$0xff] %v318_v9 }
 0x1a3   : > { %564 = shalt.err (!%p561_p10)
}
 0x1a4   : > { %s565_s25 = scalar_lea.hbm %s810_s16, 768  ;;  %s569_s29 = scalar_lea.hbm %s857_s3, 1536 }
 0x1a5   : > { %p566_p1 = scmp.ne.s32.totalorder %s810_s16, %s565_s25  ;;  %p570_p3 = scmp.lt.u32.totalorder %s810_s16, %s857_s3 }
 0x1a6   : > { %p571_p0 = scmp.lt.u32.totalorder %s569_s29, %s565_s25  ;;  %p573_p6 = scmp.lt.u32.totalorder %s565_s25, %s810_s16 }
 0x1a7   : > { %p567_p2 = pnand %p566_p1, %p738_p8 }
 0x1a8   : > { %p572_p4 = por %p571_p0, %p570_p3 }
 0x1a9   : > { %p568_p7 = pneg %p567_p2 }
 0x1aa   : > { %p574_p9 = por %p573_p6, %p572_p4 }
 0x1ac   : > { %p575_p12 = pnand %p574_p9, %p568_p7 }
 0x1ae   : > { %578 = shalt.err (!%p575_p12)
}
 0x1af   : > { %440 = dma.vmem_to_hbm [thread:$0]  (%p738_p8), %s812_s30, 768, %s810_s16, %s326_s8  }
 0x1b0 PF: > { %s352_s18 = sand.u32 1, %s609_s12   ;;  %p876_p13 = scmp.ne.s32.totalorder %s862_s19, 0 }
 0x1b1   : > { %p877_p11 = scmp.ge.s32.totalorder %s621_s15, 2  ;;  %s353_s20 = scalar_lea.sflag [#allocation4], %s352_s18 }
 0x1b3   : > { %p451_p5 = pnand %p877_p11, %p876_p13 }
 0x1b5   : > { %604 = dma.done.wait (!%p451_p5), %s353_s20, 768  }
 0x1b6   : > { %606 = vsyncadd (!%p451_p5), %s353_s20, 4294966528  ;;  %p17_p10 = scmp.ge.s32.totalorder %s694_s23, 4   ;;  %s878_s12 = smov %s613_s13 }
 0x1b7   : > { %s879_s13 = smov %s617_s14  ;;  %s880_s14 = smov %s730_s11 }
 0x1b8   : > { %s881_s15 = smov %s694_s23  ;;  %19 = sbr.rel (!%p17_p10) target bundleno = 6 (0x6), region = 81 }
 0x1bf   :  { %358 = vsyncpa [#allocation3], 1 }
 0x1c0   :  { %360 = vsyncpa [#allocation3 + $0x1], 1 }
 0x1c1   :  { %361 = vsyncpa [#allocation6], 1 }
 0x1c2   :  { %362 = vsyncpa [#allocation4], 1 }
 0x1c3   :  { %364 = vsyncpa [#allocation4 + $0x1], 1 }

// kernel: tpu_custom_call.1
= control target key start
LH: loop header
LB: loop body
LE: loop exit
PB: predicated region body
PF: predicated region fallthrough
CT: control target
= control target key end

     0   :  { %8 = vsyncpa [#allocation3], 0  ;;  %s854_s0 = inlined_call_operand.hbm [shape: f32[16,768], index: 0, kind: input, shape index: {}]   ;;  %s855_s1 = inlined_call_operand.hbm [shape: f32[1,768], index: 1, kind: input, shape index: {}]   ;;  %s856_s2 = inlined_call_operand.vmem [shape: f32[1,768], index: 2, kind: input, shape index: {}]   ;;  %s857_s3 = inlined_call_operand.hbm [shape: f32[16,768], index: 3, kind: output, shape index: {}]  }
   0x1   :  { %10 = vsyncpa [#allocation3 + $0x1], 0 }
   0x2   :  { %11 = vsyncpa [#allocation6], 0 }
   0x3   :  { %12 = vsyncpa [#allocation4], 0 }
   0x4   :  { %14 = vsyncpa [#allocation4 + $0x1], 0  ;;  %s646_s12 = smov 0   ;;  %s648_s13 = smov 0  }
   0x5   :  { %s650_s14 = smov 0   ;;  %s652_s15 = smov 0  }
   0x6 LB: > { %s667_s16 = sadd.s32 4294967295, %s621_s15   ;;  %s420_s17 = sadd.s32 4294967294, %s621_s15   ;;  %s621_s15 = sphi %s652_s15, %s881_s15   ;;  %s617_s14 = sphi %s650_s14, %s880_s14   ;;  %s613_s13 = sphi %s648_s13, %s879_s13   ;;  %s609_s12 = sphi %s646_s12, %s878_s12  }
   0x7   : > { %p40_p0 = scmp.ne.s32.totalorder %s613_s13, %s609_s12  ;;  %p858_p1 = scmp.eq.s32.totalorder %s667_s16, 0 }
   0x8   : > { %p112_p3 = scmp.eq.s32.totalorder %s420_s17, 1  ;;  %p421_p5 = scmp.ge.s32.totalorder %s621_s15, 1 }
   0x9   : > { %p676_p4 = por %p858_p1, %p40_p0  ;;  %p119_p7 = scmp.lt.s32.totalorder %s621_s15, 3 }
   0xa   : > { %p681_p6 = por %p112_p3, %p40_p0  ;;  %s623_s21 = smov [#allocation5]  }
   0xb   : > { %s861_s18 = scalar_select %p676_p4, 1, 0 }
   0xc   : > { %s862_s19 = scalar_select %p681_p6, 1, 0 }
   0xd   : > { %p686_p8 = pnand %p421_p5, %p119_p7  ;;  %s132_s22 = sshll.u32 %s623_s21, 4  ;;  %s133_s22 = int_to_ptr.vmem [resolvable:$true] %s132_s22 }
   0xe   : > { %s694_s23 = sadd.s32 1, %s621_s15   ;;  %s27_s27 = sadd.s32 1, %s617_s14 }
   0xf   : > { %s863_s20 = scalar_select %p686_p8, 1, 0 }
  0x10   : > { %p442_p10 = pneg %p686_p8  ;;  %s24_s25 = ssub.s32 %s621_s15, %s694_s23 }
  0x11   : > { %p704_p12 = scmp.eq.s32.totalorder %s24_s25, 0  ;;  %s493_s30 = scalar_lea.hbm %s855_s1, 96 }
  0x12   : > { %p698_p11 = pnand %p442_p10, %p858_p1  ;;  %p494_p0 = scmp.ne.s32.totalorder %s855_s1, %s493_s30 }
  0x13   : > { %s865_s26 = scalar_select %p704_p12, 1, 0 }
  0x14   : > { %p495_p3 = pneg %p698_p11  ;;  %p500_p10 = scmp.lt.u32.totalorder %s493_s30, %s855_s1 }
  0x16   : > { %p496_p5 = pnand %p495_p3, %p494_p0 }
  0x18   : > { %p497_p7 = pneg %p496_p5 }
  0x1a   : > { %p502_p9 = pnand %p500_p10, %p497_p7 }
  0x1c   : > { %505 = shalt.err (!%p502_p9)
}
  0x1d   : > { %s506_s8 = scalar_lea.vmem %s133_s22, 96  ;;  %p514_p6 = scmp.lt.s32.totalorder %s133_s22, %s133_s22 }
  0x1e   : > { %p507_p1 = scmp.ne.s32.totalorder %s133_s22, %s506_s8  ;;  %p515_p4 = scmp.lt.s32.totalorder %s506_s8, %s506_s8 }
  0x20   : > { %p509_p2 = pnand %p507_p1, %p495_p3  ;;  %p516_p8 = por %p515_p4, %p514_p6 }
  0x22   : > { %p510_p13 = pneg %p509_p2 }
  0x24   : > { %p517_p12 = pnand %p516_p8, %p510_p13 }
  0x26   : > { %520 = shalt.err (!%p517_p12)
}
  0x27   : > { %445 = dma.hbm_to_vmem [thread:$0]  (!%p698_p11), %s855_s1, 96, %s133_s22, [#allocation6]  }
  0x28   : > { %p866_p1 = scmp.ne.s32.totalorder %s865_s26, 0  ;;  %p35_p2 = scmp.eq.s32.totalorder %s621_s15, 0 }
  0x29   : > { %p867_p4 = scmp.ne.s32.totalorder %s617_s14, %s613_s13  ;;  %p868_p6 = scmp.eq.s32.totalorder %s667_s16, 1 }
  0x2a   : > { %s730_s11 = scalar_select %p866_p1, %s617_s14, %s27_s27  }
  0x2b   : > { %p738_p8 = por %p868_p6, %p867_p4  ;;  %p455_p9 = scmp.lt.s32.totalorder %s621_s15, 2 }
  0x2c   : > { %s146_s21 = sand.u32 1, %s617_s14   ;;  %p870_p12 = pmov %p867_p4 }
  0x2d   : > { %s430_s24 = smul.u32 48, %s146_s21  ;;  %s147_s4 = scalar_lea.sflag [#allocation3], %s146_s21 }
  0x2e   : > { %p36_p13 = por %p35_p2, %p870_p12  ;;  %s431_s25 = smul.u32 768, %s621_s15 }
  0x2f   : > { %s150_s29 = scalar_lea.vmem [#allocation2], %s430_s24  ;;  %s526_s8 = scalar_lea.hbm %s854_s0, 1536 }
  0x30   : > { %p748_p0 = pnand %p455_p9, %p36_p13  ;;  %s755_s27 = scalar_lea.hbm %s854_s0, %s431_s25 }
  0x31   : > { %s158_s30 = sshll.u32 %s150_s29, 4  ;;  %s521_s5 = scalar_lea.hbm %s755_s27, 768  ;;  %s757_s30 = int_to_ptr.vmem [resolvable:$true] %s158_s30 }
  0x32   : > { %p522_p11 = scmp.ne.s32.totalorder %s755_s27, %s521_s5  ;;  %p523_p3 = pneg %p748_p0 }
  0x33   : > { %p527_p10 = scmp.lt.u32.totalorder %s755_s27, %s854_s0  ;;  %p528_p1 = scmp.lt.u32.totalorder %s526_s8, %s521_s5 }
  0x34   : > { %p524_p5 = pnand %p523_p3, %p522_p11  ;;  %p530_p4 = scmp.lt.u32.totalorder %s521_s5, %s755_s27 }
  0x35   : > { %p529_p2 = por %p528_p1, %p527_p10 }
  0x36   : > { %p525_p7 = pneg %p524_p5 }
  0x37   : > { %p531_p6 = por %p530_p4, %p529_p2 }
  0x39   : > { %p532_p9 = pnand %p531_p6, %p525_p7 }
  0x3b   : > { %535 = shalt.err (!%p532_p9)
}
  0x3c   : > { %s536_s21 = scalar_lea.vmem %s757_s30, 768  ;;  %s624_s24 = smov [#allocation2]  }
  0x3d   : > { %p537_p12 = scmp.ne.s32.totalorder %s757_s30, %s536_s21  ;;  %s541_s25 = sshll.u32 %s624_s24, 4  ;;  %s542_s25 = int_to_ptr.vmem [resolvable:$false] %s541_s25 }
  0x3e   : > { %s543_s22 = scalar_lea.vmem %s542_s25, 1536  ;;  %p544_p5 = scmp.lt.s32.totalorder %s757_s30, %s542_s25 }
  0x3f   : > { %p539_p13 = pnand %p537_p12, %p523_p3  ;;  %p545_p10 = scmp.lt.s32.totalorder %s543_s22, %s536_s21 }
  0x41   : > { %p540_p11 = pneg %p539_p13  ;;  %p546_p1 = por %p545_p10, %p544_p5 }
  0x43   : > { %p547_p2 = pnand %p546_p1, %p540_p11 }
  0x45   : > { %550 = shalt.err (!%p547_p2)
}
  0x46   : > { %449 = dma.hbm_to_vmem [thread:$0]  (!%p748_p0), %s755_s27, 768, %s757_s30, %s147_s4  }
  0x47   : > { %p872_p7 = scmp.ne.s32.totalorder %s863_s20, 0 }
  0x48   : > { %s787_s26 = sand.u32 (!%p872_p7), 1, %s613_s13   ;;  %p873_p3 = scmp.ne.s32.totalorder (!%p872_p7), %s861_s18, 0 }
  0x49   : > { %167 = sbr.rel (%p872_p7) target bundleno = 432 (0x1b0), region = 32  ;;  %s170_s5 = scalar_lea.sflag (!%p872_p7), [#allocation3], %s787_s26 }
  0x4a   : > { %s432_s29 = smul.u32 (!%p872_p7), 48, %s787_s26 }
  0x4c   : > { %s173_s6 = scalar_lea.vmem (!%p872_p7), [#allocation2], %s432_s29 }
  0x50   : > { %596 = dma.done.wait (%p873_p3), %s170_s5, 768  }
  0x51   : > { %598 = vsyncadd (%p873_p3), %s170_s5, 4294966528  ;;  %p874_p0 = scmp.eq.s32.totalorder %s667_s16, 0 }
  0x53   : > { %600 = dma.done.wait (%p874_p0), [#allocation6], 96   ;;  %p875_p4 = pmov %p874_p0 }
  0x54   : > { %v200_v0 = vld [vmem:[%s173_s6] sm:$0xff]  ;;  %v201_v1 = vld [vmem:[%s173_s6 + $0x8] sm:$0xff]  ;;  %v202_v2 = vld [vmem:[%s173_s6 + $0x10] sm:$0xff]  ;;  %v246_v32 = vlaneseq  ;;  %s433_s28 = smul.u32 768, %s667_s16  ;;  %s199_s27 = scalar_lea.vmem [#allocation7], %s432_s29 }
  0x55   : > { %602 = vsyncadd (%p875_p4), [#allocation6], 4294967200  ;;  %v208_v3 = vadd.f32 %v201_v1, %v200_v0  ;;  %v203_v4 = vld [vmem:[%s173_s6 + $0x18] sm:$0xff]  ;;  %v204_v6 = vld [vmem:[%s173_s6 + $0x20] sm:$0xff]  ;;  %s340_s30 = sshll.u32 %s199_s27, 4  ;;  %s326_s8 = scalar_lea.sflag [#allocation4], %s787_s26  ;;  %s812_s30 = int_to_ptr.vmem [resolvable:$true] %s340_s30 }
  0x56   : > { %v205_v8 = vld [vmem:[%s173_s6 + $0x28] sm:$0xff]  ;;  %v247_v34 = vshrl.u32 %v246_v32, 7  ;;  %v206_v37 = vld [vmem:[#allocation5] sm:$0x3f]  ;;  %s810_s16 = scalar_lea.hbm %s857_s3, %s433_s28  ;;  %s551_s9 = scalar_lea.vmem %s812_s30, 768 }
  0x57   : > { %v209_v5 = vadd.f32 %v208_v3, %v202_v2  ;;  %v207_v42 = vld [vmem:[%s856_s2] sm:$0x3f]  ;;  %p552_p6 = scmp.ne.s32.totalorder %s812_s30, %s551_s9  ;;  %s625_s10 = smov [#allocation7]  }
  0x58   : > { %v248_v35 = vsub.s32 0, %v247_v34  ;;  %v252_v36 = vsub.s32 1, %v247_v34  ;;  %v256_v38 = vsub.s32 2, %v247_v34  ;;  %v260_v39 = vsub.s32 3, %v247_v34  ;;  %s555_s21 = sshll.u32 %s625_s10, 4  ;;  %s556_s21 = int_to_ptr.vmem [resolvable:$false] %s555_s21 }
  0x59   : > { %v210_v7 = vadd.f32 %v209_v5, %v203_v4  ;;  %v264_v40 = vsub.s32 4, %v247_v34  ;;  %v268_v41 = vsub.s32 5, %v247_v34  ;;  %p553_p9 = pnand %p552_p6, %p738_p8  ;;  %s557_s24 = scalar_lea.vmem %s556_s21, 1536 }
  0x5a   : > { %v249_v43 = vrot.slane %v206_v37, %v248_v35  ;;  %v253_v44 = vrot.slane %v206_v37, %v252_v36  ;;  %v257_v45 = vrot.slane %v206_v37, %v256_v38  ;;  %v261_v46 = vrot.slane %v206_v37, %v260_v39  ;;  %p558_p13 = scmp.lt.s32.totalorder %s812_s30, %s556_s21  ;;  %p559_p11 = scmp.lt.s32.totalorder %s557_s24, %s551_s9 }
  0x5b   : > { %v211_v9 = vadd.f32 %v210_v7, %v204_v6  ;;  %v265_v47 = vrot.slane %v206_v37, %v264_v40  ;;  %v269_v48 = vrot.slane %v206_v37, %v268_v41  ;;  %v286_v50 = vrot.slane %v207_v42, %v248_v35  ;;  %p554_p12 = pneg %p553_p9 }
  0x5c   : > { %v290_v51 = vrot.slane %v207_v42, %v252_v36  ;;  %v294_v52 = vrot.slane %v207_v42, %v256_v38  ;;  %v298_v53 = vrot.slane %v207_v42, %v260_v39  ;;  %v302_v60 = vrot.slane %v207_v42, %v264_v40  ;;  %p560_p5 = por %p559_p11, %p558_p13 }
  0x5d   : > { %v212_v10 = vadd.f32 %v211_v9, %v205_v8  ;;  %v306_v61 = vrot.slane %v207_v42, %v268_v41 }
  0x5e   : > { %p561_p10 = pnand %p560_p5, %p554_p12 }
  0x5f   : > { %213 = vadd.xlane.f32.xlu0 %v212_v10 }
  0xec   : > { %v214_v11 = vpop.xlane.xlu0 %213 }
  0xed   : > { %v216_v12 = vmul.f32 0.0013020834, %v214_v11 }
  0xef   : > { %v217_v13 = vsub.f32 %v200_v0, %v216_v12  ;;  %v218_v14 = vsub.f32 %v201_v1, %v216_v12  ;;  %v219_v15 = vsub.f32 %v202_v2, %v216_v12  ;;  %v220_v16 = vsub.f32 %v203_v4, %v216_v12 }
  0xf0   : > { %v221_v19 = vsub.f32 %v204_v6, %v216_v12  ;;  %v222_v22 = vsub.f32 %v205_v8, %v216_v12 }
  0xf1   : > { %v223_v17 = vmul.f32 %v217_v13, %v217_v13  ;;  %v224_v18 = vmul.f32 %v218_v14, %v218_v14  ;;  %v225_v20 = vmul.f32 %v219_v15, %v219_v15  ;;  %v226_v23 = vmul.f32 %v220_v16, %v220_v16 }
  0xf2   : > { %v227_v25 = vmul.f32 %v221_v19, %v221_v19  ;;  %v228_v27 = vmul.f32 %v222_v22, %v222_v22 }
  0xf3   : > { %v229_v21 = vadd.f32 %v224_v18, %v223_v17 }
  0xf5   : > { %v230_v24 = vadd.f32 %v229_v21, %v225_v20 }
  0xf7   : > { %v231_v26 = vadd.f32 %v230_v24, %v226_v23 }
  0xf9   : > { %v232_v28 = vadd.f32 %v231_v26, %v227_v25 }
  0xfb   : > { %v233_v29 = vadd.f32 %v232_v28, %v228_v27 }
  0xfd   : > { %234 = vadd.xlane.f32.xlu0 %v233_v29 }
 0x18a   : > { %v235_v30 = vpop.xlane.xlu0 %234 }
 0x18b   : > { %v236_v31 = vmul.f32 0.0013020834, %v235_v30 }
 0x18d   : > { %v237_v33 = vadd.f32 1e-12, %v236_v31 }
 0x18f   : > { %491 = vrsqrt.f32 %v237_v33 }
 0x199   : > { %v492_v49 = vpop.eup %491 }
 0x19a   : > { %v239_v54 = vmul.f32 %v492_v49, %v217_v13  ;;  %v240_v55 = vmul.f32 %v492_v49, %v218_v14  ;;  %v241_v56 = vmul.f32 %v492_v49, %v219_v15  ;;  %v242_v57 = vmul.f32 %v492_v49, %v220_v16 }
 0x19b   : > { %v243_v58 = vmul.f32 %v492_v49, %v221_v19  ;;  %v244_v59 = vmul.f32 %v492_v49, %v222_v22 }
 0x19c   : > { %v276_v62 = vmul.f32 %v249_v43, %v239_v54  ;;  %v277_v63 = vmul.f32 %v253_v44, %v240_v55  ;;  %v278_v0 = vmul.f32 %v257_v45, %v241_v56  ;;  %v279_v1 = vmul.f32 %v261_v46, %v242_v57 }
 0x19d   : > { %v280_v2 = vmul.f32 %v265_v47, %v243_v58  ;;  %v281_v3 = vmul.f32 %v269_v48, %v244_v59 }
 0x19e   : > { %v313_v4 = vadd.f32 %v286_v50, %v276_v62  ;;  %v314_v5 = vadd.f32 %v290_v51, %v277_v63  ;;  %v315_v6 = vadd.f32 %v294_v52, %v278_v0  ;;  %v316_v7 = vadd.f32 %v298_v53, %v279_v1 }
 0x19f   : > { %v317_v8 = vadd.f32 %v302_v60, %v280_v2  ;;  %v318_v9 = vadd.f32 %v306_v61, %v281_v3 }
 0x1a0   : > { %319 = vst [vmem:[%s199_s27] sm:$0xff] %v313_v4  ;;  %320 = vst [vmem:[%s199_s27 + $0x8] sm:$0xff] %v314_v5 }
 0x1a1   : > { %321 = vst [vmem:[%s199_s27 + $0x10] sm:$0xff] %v315_v6  ;;  %322 = vst [vmem:[%s199_s27 + $0x18] sm:$0xff] %v316_v7 }
 0x1a2   : > { %323 = vst [vmem:[%s199_s27 + $0x20] sm:$0xff] %v317_v8  ;;  %324 = vst [vmem:[%s199_s27 + $0x28] sm:$0xff] %v318_v9 }
 0x1a3   : > { %564 = shalt.err (!%p561_p10)
}
 0x1a4   : > { %s565_s25 = scalar_lea.hbm %s810_s16, 768  ;;  %s569_s29 = scalar_lea.hbm %s857_s3, 1536 }
 0x1a5   : > { %p566_p1 = scmp.ne.s32.totalorder %s810_s16, %s565_s25  ;;  %p570_p3 = scmp.lt.u32.totalorder %s810_s16, %s857_s3 }
 0x1a6   : > { %p571_p0 = scmp.lt.u32.totalorder %s569_s29, %s565_s25  ;;  %p573_p6 = scmp.lt.u32.totalorder %s565_s25, %s810_s16 }
 0x1a7   : > { %p567_p2 = pnand %p566_p1, %p738_p8 }
 0x1a8   : > { %p572_p4 = por %p571_p0, %p570_p3 }
 0x1a9   : > { %p568_p7 = pneg %p567_p2 }
 0x1aa   : > { %p574_p9 = por %p573_p6, %p572_p4 }
 0x1ac   : > { %p575_p12 = pnand %p574_p9, %p568_p7 }
 0x1ae   : > { %578 = shalt.err (!%p575_p12)
}
 0x1af   : > { %440 = dma.vmem_to_hbm [thread:$0]  (%p738_p8), %s812_s30, 768, %s810_s16, %s326_s8  }
 0x1b0 PF: > { %s352_s18 = sand.u32 1, %s609_s12   ;;  %p876_p13 = scmp.ne.s32.totalorder %s862_s19, 0 }
 0x1b1   : > { %p877_p11 = scmp.ge.s32.totalorder %s621_s15, 2  ;;  %s353_s20 = scalar_lea.sflag [#allocation4], %s352_s18 }
 0x1b3   : > { %p451_p5 = pnand %p877_p11, %p876_p13 }
 0x1b5   : > { %604 = dma.done.wait (!%p451_p5), %s353_s20, 768  }
 0x1b6   : > { %606 = vsyncadd (!%p451_p5), %s353_s20, 4294966528  ;;  %p17_p10 = scmp.ge.s32.totalorder %s694_s23, 4   ;;  %s878_s12 = smov %s613_s13 }
 0x1b7   : > { %s879_s13 = smov %s617_s14  ;;  %s880_s14 = smov %s730_s11 }
 0x1b8   : > { %s881_s15 = smov %s694_s23  ;;  %19 = sbr.rel (!%p17_p10) target bundleno = 6 (0x6), region = 81 }
 0x1bf   :  { %358 = vsyncpa [#allocation3], 1 }
 0x1c0   :  { %360 = vsyncpa [#allocation3 + $0x1], 1 }
 0x1c1   :  { %361 = vsyncpa [#allocation6], 1 }
 0x1c2   :  { %362 = vsyncpa [#allocation4], 1 }
 0x1c3   :  { %364 = vsyncpa [#allocation4 + $0x1], 1 }

</bundles_post_ra>
